<compile_context>
chip_gen: v6e
topology: v6e:2x2x1
jax: 0.10.0
libtpu: 0.0.40
codegen_flags: <defaults>
</compile_context>

<pallas_src>
import jax
import jax.numpy as jnp
from jax.experimental import pallas as pl
from jax.experimental.pallas import tpu as pltpu

_LANE = 128


def bpnet_kernel(x_ref, w1_ref, b1_ref, w2_ref, b2_ref, o_ref):
    # Linear(input_layers, hidden_padded) + ReLU.  Accumulate in f32 on the MXU.
    h = jnp.dot(x_ref[...], w1_ref[...], preferred_element_type=jnp.float32)
    h = jnp.maximum(h + b1_ref[...], 0.0)

    # Linear(hidden_padded, output_size).  Cast only the MXU operand if the
    # weights are bf16; bias add stays in f32.
    logits = jnp.dot(h.astype(w2_ref.dtype), w2_ref[...],
                     preferred_element_type=jnp.float32) + b2_ref[...]

    o_count = logits.shape[-1]
    if o_count == 2:
        # Closed-form 2-class softmax: pure VPU/EUP, no cross-lane reductions.
        l0 = logits[:, 0:1]
        l1 = logits[:, 1:2]
        p0 = 1.0 / (1.0 + jnp.exp(l1 - l0))   # == softmax(logits)[:, 0]
        p1 = 1.0 - p0
        col = jax.lax.broadcasted_iota(jnp.int32, logits.shape, 1)
        probs = jnp.where(col == 0, p0, p1)
    else:
        # General fallback (numerically stable softmax over the last axis).
        m = jnp.max(logits, axis=-1, keepdims=True)
        e = jnp.exp(logits - m)
        probs = e * pl.reciprocal(jnp.sum(e, axis=-1, keepdims=True), approx=False)

    o_ref[...] = probs.astype(o_ref.dtype)


def _forward_whole(x, w1, b1, w2, b2):
    """Small-problem path: no grid, every operand fully VMEM-resident."""
    b, _ = x.shape
    o = w2.shape[1]
    vmem = lambda: pl.BlockSpec(memory_space=pltpu.MemorySpace.VMEM)
    return pl.pallas_call(
        bpnet_kernel,
        out_shape=jax.ShapeDtypeStruct((b, o), jnp.float32),
        in_specs=[vmem() for _ in range(5)],
        out_specs=vmem(),
    )(x, w1, b1, w2, b2)


def _forward_tiled(x, w1, b1, w2, b2, tb):
    """Batch-tiled path: x/out stream, weights stay resident across the grid."""
    b, f = x.shape
    hp = w1.shape[1]
    o = w2.shape[1]
    assert b % tb == 0

    flops = 2 * b * (f * hp + hp * o)
    bytes_accessed = int(
        x.size * x.dtype.itemsize + w1.size * w1.dtype.itemsize
        + b1.size * b1.dtype.itemsize + w2.size * w2.dtype.itemsize
        + b2.size * b2.dtype.itemsize + b * o * 4)

    return pl.pallas_call(
        bpnet_kernel,
        out_shape=jax.ShapeDtypeStruct((b, o), jnp.float32),
        grid=(b // tb,),
        in_specs=[
            pl.BlockSpec((tb, f), lambda i: (i, 0)),    # x streams over batch
            pl.BlockSpec((f, hp), lambda i: (0, 0)),    # weights: resident
            pl.BlockSpec((1, hp), lambda i: (0, 0)),
            pl.BlockSpec((hp, o), lambda i: (0, 0)),
            pl.BlockSpec((1, o), lambda i: (0, 0)),
        ],
        out_specs=pl.BlockSpec((tb, o), lambda i: (i, 0)),
        compiler_params=pltpu.CompilerParams(
            # batch tiles are independent -> shard across TensorCores on v7x.
            dimension_semantics=("parallel",),
            # NOTE: if tb / F / H are ever scaled up, set vmem_limit_bytes
            # explicitly and budget against v7x's 64 MiB physical VMEM.
        ),
        cost_estimate=pl.CostEstimate(
            flops=flops, transcendentals=b, bytes_accessed=bytes_accessed),
    )(x, w1, b1, w2, b2)


def bpnet_forward(x, w1, b1, w2, b2, *, block_b=None, mxu_dtype=None):
    """softmax(relu(x @ w1 + b1) @ w2 + b2, axis=-1).

    w1: (F, H), b1: (1, H), w2: (H, O), b2: (1, O) — transposed vs. PyTorch.
    block_b:   optional batch tile size (use for large B; weights stay resident).
    mxu_dtype: optional dtype (e.g. jnp.bfloat16) for the matmul operands only;
               accumulation, bias, ReLU and softmax stay in f32.
    """
    b_sz, _ = x.shape
    h = w1.shape[1]

    # Lane-align the hidden dimension (zero padding is exact).
    hp = ((h + _LANE - 1) // _LANE) * _LANE
    if hp != h:
        w1 = jnp.pad(w1, ((0, 0), (0, hp - h)))
        b1 = jnp.pad(b1, ((0, 0), (0, hp - h)))
        w2 = jnp.pad(w2, ((0, hp - h), (0, 0)))

    if mxu_dtype is not None:
        x = x.astype(mxu_dtype)
        w1 = w1.astype(mxu_dtype)
        w2 = w2.astype(mxu_dtype)
    b1 = b1.astype(jnp.float32)
    b2 = b2.astype(jnp.float32)

    if block_b is None:
        return _forward_whole(x, w1, b1, w2, b2)

    bp = ((b_sz + block_b - 1) // block_b) * block_b
    if bp != b_sz:
        x = jnp.pad(x, ((0, bp - b_sz), (0, 0)))
    out = _forward_tiled(x, w1, b1, w2, b2, block_b)
    return out[:b_sz]


def reference_forward(x, w1, b1, w2, b2):
    h = jnp.maximum(x @ w1 + b1, 0.0)
    return jax.nn.softmax(h @ w2 + b2, axis=-1)


def init_params(key, input_layers, hidden_layers, output_size):
    # Deterministic init mimicking PyTorch nn.Linear default (uniform +/- 1/sqrt(fan_in)).
    k1, k2, k3, k4 = jax.random.split(key, 4)
    bound1 = 1.0 / (input_layers ** 0.5)
    bound2 = 1.0 / (hidden_layers ** 0.5)
    w1 = jax.random.uniform(k1, (input_layers, hidden_layers), jnp.float32, -bound1, bound1)
    b1 = jax.random.uniform(k2, (1, hidden_layers), jnp.float32, -bound1, bound1)
    w2 = jax.random.uniform(k3, (hidden_layers, output_size), jnp.float32, -bound2, bound2)
    b2 = jax.random.uniform(k4, (1, output_size), jnp.float32, -bound2, bound2)
    return w1, b1, w2, b2


if __name__ == "__main__":
    # Module hyperparameters: attribute=3, time_length=8 -> input_layers=24,
    # hidden_layers=70, output_size=2, batch=2.
    attribute = 3
    time_length = 8
    input_layers = attribute * time_length
    hidden_layers = 70
    output_size = 2
    batch = 2

    key = jax.random.PRNGKey(0)
    kx, kp = jax.random.split(key)
    x = jax.random.normal(kx, (batch, input_layers), jnp.float32)
    w1, b1, w2, b2 = init_params(kp, input_layers, hidden_layers, output_size)

    # 1) Small-shape path: no grid, whole-array VMEM residency.
    ref = reference_forward(x, w1, b1, w2, b2)
    out = jax.block_until_ready(bpnet_forward(x, w1, b1, w2, b2))
    assert out.shape == (batch, output_size)
    assert jnp.allclose(jnp.sum(out, axis=-1), 1.0, atol=1e-5)
    assert jnp.allclose(out, ref, atol=1e-2)

    # 2) Batch-tiled path (what would be used at realistic batch sizes).
    big_batch = 256
    xb = jax.random.normal(kx, (big_batch, input_layers), jnp.float32)
    refb = reference_forward(xb, w1, b1, w2, b2)
    outb = jax.block_until_ready(bpnet_forward(xb, w1, b1, w2, b2, block_b=128))
    assert outb.shape == (big_batch, output_size)
    assert jnp.allclose(jnp.sum(outb, axis=-1), 1.0, atol=1e-5)
    assert jnp.allclose(outb, refb, atol=1e-2)

    # 3) bf16 MXU operands (recommended on v6e/v7x), f32 accumulate/elementwise.
    out_bf16 = jax.block_until_ready(
        bpnet_forward(xb, w1, b1, w2, b2, block_b=128, mxu_dtype=jnp.bfloat16))
    assert jnp.allclose(jnp.sum(out_bf16, axis=-1), 1.0, atol=1e-5)
    assert jnp.allclose(out_bf16, refb, atol=3e-2)

    print("KERNEL_OK")
</pallas_src>

<mosaic_0001>
module attributes {stable_mosaic.version = 11 : i64} {
  func.func @bpnet_kernel(%arg0: memref<2x24xf32, #tpu.memory_space<vmem>>, %arg1: memref<24x128xf32, #tpu.memory_space<vmem>>, %arg2: memref<1x128xf32, #tpu.memory_space<vmem>>, %arg3: memref<128x2xf32, #tpu.memory_space<vmem>>, %arg4: memref<1x2xf32, #tpu.memory_space<vmem>>, %arg5: memref<2x2xf32, #tpu.memory_space<vmem>>) attributes {dimension_semantics = [], scalar_prefetch = 0 : i64, scratch_operands = 0 : i64, tpu.core_type = #tpu.core_type<tc>} {
    %c0 = arith.constant 0 : index
    %c0_0 = arith.constant 0 : index
    %0 = vector.load %arg0[%c0, %c0_0] : memref<2x24xf32, #tpu.memory_space<vmem>>, vector<2x24xf32>
    %c0_1 = arith.constant 0 : index
    %c0_2 = arith.constant 0 : index
    %1 = vector.load %arg1[%c0_1, %c0_2] : memref<24x128xf32, #tpu.memory_space<vmem>>, vector<24x128xf32>
    %cst = arith.constant dense<0.000000e+00> : vector<2x128xf32>
    %2 = tpu.matmul %0, %1, %cst {dimension_numbers = #tpu.dot_dimension_numbers<[1], [0], [0], [1], [0, 0, 1, 1], [], []>} : vector<2x24xf32>, vector<24x128xf32>, vector<2x128xf32> -> vector<2x128xf32>
    %c0_3 = arith.constant 0 : index
    %c0_4 = arith.constant 0 : index
    %3 = vector.load %arg2[%c0_3, %c0_4] : memref<1x128xf32, #tpu.memory_space<vmem>>, vector<1x128xf32>
    %4 = vector.broadcast %3 : vector<1x128xf32> to vector<2x128xf32>
    %5 = arith.addf %2, %4 : vector<2x128xf32>
    %cst_5 = arith.constant 0.000000e+00 : f32
    %6 = vector.broadcast %cst_5 : f32 to vector<2x128xf32>
    %7 = arith.maximumf %5, %6 : vector<2x128xf32>
    %c0_6 = arith.constant 0 : index
    %c0_7 = arith.constant 0 : index
    %8 = vector.load %arg3[%c0_6, %c0_7] : memref<128x2xf32, #tpu.memory_space<vmem>>, vector<128x2xf32>
    %cst_8 = arith.constant dense<0.000000e+00> : vector<2x2xf32>
    %9 = tpu.matmul %7, %8, %cst_8 {dimension_numbers = #tpu.dot_dimension_numbers<[1], [0], [0], [1], [0, 0, 1, 1], [], []>} : vector<2x128xf32>, vector<128x2xf32>, vector<2x2xf32> -> vector<2x2xf32>
    %c0_9 = arith.constant 0 : index
    %c0_10 = arith.constant 0 : index
    %10 = vector.load %arg4[%c0_9, %c0_10] : memref<1x2xf32, #tpu.memory_space<vmem>>, vector<1x2xf32>
    %11 = vector.broadcast %10 : vector<1x2xf32> to vector<2x2xf32>
    %12 = arith.addf %9, %11 : vector<2x2xf32>
    %13 = vector.extract_strided_slice %12 {offsets = [0, 0], sizes = [2, 1], strides = [1, 1]} : vector<2x2xf32> to vector<2x1xf32>
    %14 = vector.extract_strided_slice %12 {offsets = [0, 1], sizes = [2, 1], strides = [1, 1]} : vector<2x2xf32> to vector<2x1xf32>
    %15 = arith.subf %14, %13 : vector<2x1xf32>
    %16 = math.exp %15 : vector<2x1xf32>
    %cst_11 = arith.constant 1.000000e+00 : f32
    %17 = vector.broadcast %cst_11 : f32 to vector<2x1xf32>
    %18 = arith.addf %17, %16 : vector<2x1xf32>
    %cst_12 = arith.constant 1.000000e+00 : f32
    %19 = vector.broadcast %cst_12 : f32 to vector<2x1xf32>
    %20 = arith.divf %19, %18 : vector<2x1xf32>
    %cst_13 = arith.constant 1.000000e+00 : f32
    %21 = vector.broadcast %cst_13 : f32 to vector<2x1xf32>
    %22 = arith.subf %21, %20 : vector<2x1xf32>
    %23 = tpu.iota {dimensions = array<i32: 1>} : vector<2x2xi32>
    %c0_i32 = arith.constant 0 : i32
    %24 = vector.broadcast %c0_i32 : i32 to vector<2x2xi32>
    %25 = arith.cmpi eq, %23, %24 : vector<2x2xi32>
    %26 = vector.shape_cast %20 : vector<2x1xf32> to vector<2x1xf32>
    %27 = vector.broadcast %26 : vector<2x1xf32> to vector<2x2xf32>
    %28 = vector.shape_cast %22 : vector<2x1xf32> to vector<2x1xf32>
    %29 = vector.broadcast %28 : vector<2x1xf32> to vector<2x2xf32>
    %30 = arith.select %25, %27, %29 : vector<2x2xi1>, vector<2x2xf32>
    %c0_14 = arith.constant 0 : index
    %c0_15 = arith.constant 0 : index
    %31 = vector.load %arg5[%c0_14, %c0_15] : memref<2x2xf32, #tpu.memory_space<vmem>>, vector<2x2xf32>
    tpu.vector_store %arg5[%c0_14, %c0_15], %30 {strides = array<i32>} : memref<2x2xf32, #tpu.memory_space<vmem>>, vector<2x2xf32>,
    return
  }
}

</mosaic_0001>

<bundles_post_ra>
// kernel: tpu_custom_call.1
= control target key start
LH: loop header
LB: loop body
LE: loop exit
PB: predicated region body
PF: predicated region fallthrough
CT: control target
= control target key end

     0   :  { %v342_v1 = vmov 0.0   ;;  %vm343_vm0 = vmmov 0   ;;  %vm32_vm1 = vcmask 195584   ;;  %s448_s0 = inlined_call_operand.vmem [shape: f32[2,24], index: 0, kind: input, shape index: {}]   ;;  %s449_s1 = inlined_call_operand.vmem [shape: f32[24,128], index: 1, kind: input, shape index: {}]   ;;  %s450_s2 = inlined_call_operand.vmem [shape: f32[1,128], index: 2, kind: input, shape index: {}]   ;;  %s451_s3 = inlined_call_operand.vmem [shape: f32[128,2], index: 3, kind: input, shape index: {}]   ;;  %s452_s4 = inlined_call_operand.vmem [shape: f32[1,2], index: 4, kind: input, shape index: {}]   ;;  %s453_s5 = inlined_call_operand.hbm [shape: f32[2,2], index: 5, kind: output, shape index: {}]  }
   0x1   :  { %v24_v0 = vld [vmem:[%s449_s1 + $0x10] sm:$0xff]  ;;  %265 = vmatprep.subr.mxu0 %v342_v1  ;;  %v23_v2 = vld [vmem:[%s449_s1 + $0x8] sm:$0xff]  ;;  %271 = vmatprep.mubr.msk.f32.mxu0 %vm343_vm0, %v342_v1  ;;  %v122_v3 = vld [vmem:[%s451_s3 + $0x78] sm:$0xff] }
   0x2   :  { %266 = vmatpush3.msra.mxu0 %v24_v0  ;;  %274 = vmatprep.subr.mxu1 %v342_v1  ;;  %v121_v4 = vld [vmem:[%s451_s3 + $0x70] sm:$0xff]  ;;  %v22_v5 = vld [vmem:[%s449_s1] sm:$0xff]  ;;  %v120_v7 = vld [vmem:[%s451_s3 + $0x68] sm:$0xff] }
   0x3   :  { %267 = vmatprep.subr.mxu0 %v342_v1  ;;  %275 = vmatpush3.msra.mxu1 %v122_v3  ;;  %v21_v6 = vld [vmem:[%s448_s0] sm:$0x3] }
   0x4   :  { %268 = vmatpush3.msra.mxu0 %v23_v2  ;;  %276 = vmatprep.subr.mxu1 %v342_v1  ;;  %v119_v8 = vld [vmem:[%s451_s3 + $0x60] sm:$0xff] }
   0x5   :  { %269 = vmatprep.subr.mxu0 %v342_v1  ;;  %277 = vmatpush3.msra.mxu1 %v121_v4 }
   0x6   :  { %270 = vmatpush3.msra.mxu0 %v22_v5  ;;  %278 = vmatprep.subr.mxu1 %v342_v1 }
   0x7   :  { %10 = vsyncpa [#allocation3], 0  ;;  %272 = vmatmul.mubr.msk.f32.vlgmr.msra.gmra.mxu0 %vm32_vm1, %v21_v6  ;;  %279 = vmatpush3.msra.mxu1 %v120_v7  ;;  %v118_v9 = vld [vmem:[%s451_s3 + $0x58] sm:$0xff]  ;;  %v117_v10 = vld [vmem:[%s451_s3 + $0x50] sm:$0xff]  ;;  %s344_s0 = smov 1   ;;  %v345_v30 = vmov 1   ;;  %v211_v38 = vlaneseq }
   0x8   :  { %280 = vmatprep.subr.mxu1 %v342_v1  ;;  %306 = vmatprep.mubr.msk.f32.mxu1 %vm343_vm0, %v342_v1  ;;  %v116_v11 = vld [vmem:[%s451_s3 + $0x48] sm:$0xff]  ;;  %v115_v12 = vld [vmem:[%s451_s3 + $0x40] sm:$0xff]  ;;  %v114_v13 = vld [vmem:[%s451_s3 + $0x38] sm:$0xff]  ;;  %vm225_vm3 = vcmask 9216  }
   0x9   :  { %281 = vmatpush3.msra.mxu1 %v119_v8  ;;  %v113_v14 = vld [vmem:[%s451_s3 + $0x30] sm:$0xff]  ;;  %v112_v15 = vld [vmem:[%s451_s3 + $0x28] sm:$0xff]  ;;  %v111_v16 = vld [vmem:[%s451_s3 + $0x20] sm:$0xff]  ;;  %314 = vset.pattern.permute.xlu0 %v345_v30  ;;  %v212_v39 = vand.u32 127, %v211_v38 }
   0xa   :  { %282 = vmatprep.subr.mxu1 %v342_v1  ;;  %v110_v17 = vld [vmem:[%s451_s3 + $0x18] sm:$0xff]  ;;  %v109_v18 = vld [vmem:[%s451_s3 + $0x10] sm:$0xff]  ;;  %v108_v19 = vld [vmem:[%s451_s3 + $0x8] sm:$0xff]  ;;  %315 = vset.pattern.permute.xlu1 %v345_v30 }
   0xb   :  { %283 = vmatpush3.msra.mxu1 %v118_v9  ;;  %v107_v20 = vld [vmem:[%s451_s3] sm:$0xff]  ;;  %vm213_vm2 = vcmp.eq.s32.totalorder %v212_v39, 0 }
   0xc   :  { %284 = vmatprep.subr.mxu1 %v342_v1  ;;  %v241_v21 = vld [vmem:[%s450_s2] ss:$0 sm:$0xff]  ;;  %s346_s2 = smov [#allocation2]  }
   0xd   :  { %285 = vmatpush3.msra.mxu1 %v117_v10  ;;  %v243_v26 = vld [vmem:[%s452_s4] ss:$0 sm:$0xff]  ;;  %s233_s3 = sshll.u32 %s346_s2, 4  ;;  %s234_s3 = int_to_ptr.vmem [resolvable:$true] %s233_s3 }
   0xe   :  { %286 = vmatprep.subr.mxu1 %v342_v1  ;;  %s320_s4 = scalar_lea.vmem %s234_s3, 32  ;;  %p325_p1 = scmp.lt.s32.totalorder %s234_s3, %s234_s3 }
   0xf   :  { %287 = vmatpush3.msra.mxu1 %v116_v11  ;;  %p321_p0 = scmp.ne.s32.totalorder %s234_s3, %s320_s4  ;;  %p326_p2 = scmp.lt.s32.totalorder %s320_s4, %s320_s4 }
  0x10   :  { %288 = vmatprep.subr.mxu1 %v342_v1 }
  0x11   :  { %289 = vmatpush3.msra.mxu1 %v115_v12  ;;  %p327_p3 = por %p326_p2, %p325_p1 }
  0x12   :  { %290 = vmatprep.subr.mxu1 %v342_v1 }
  0x13   :  { %291 = vmatpush3.msra.mxu1 %v114_v13  ;;  %p328_p4 = pnand %p327_p3, %p321_p0 }
  0x14   :  { %292 = vmatprep.subr.mxu1 %v342_v1 }
  0x15   :  { %293 = vmatpush3.msra.mxu1 %v113_v14 }
  0x16   :  { %294 = vmatprep.subr.mxu1 %v342_v1 }
  0x17   :  { %295 = vmatpush3.msra.mxu1 %v112_v15 }
  0x18   :  { %296 = vmatprep.subr.mxu1 %v342_v1 }
  0x19   :  { %297 = vmatpush3.msra.mxu1 %v111_v16 }
  0x1a   :  { %298 = vmatprep.subr.mxu1 %v342_v1 }
  0x1b   :  { %299 = vmatpush3.msra.mxu1 %v110_v17 }
  0x1c   :  { %300 = vmatprep.subr.mxu1 %v342_v1 }
  0x1d   :  { %301 = vmatpush3.msra.mxu1 %v109_v18 }
  0x1e   :  { %302 = vmatprep.subr.mxu1 %v342_v1 }
  0x1f   :  { %303 = vmatpush3.msra.mxu1 %v108_v19 }
  0x20   :  { %304 = vmatprep.subr.mxu1 %v342_v1 }
  0x21   :  { %305 = vmatpush3.msra.mxu1 %v107_v20 }
  0xc7   :  { %v102_v22 = vpop.f32.mrf.mxu0 }
  0xc8   :  { %v103_v23 = vadd.f32 %v241_v21, %v102_v22 }
  0xc9   :  { %v273_v24 = vpop.f32.mrf.mxu0 }
  0xca   :  { %v106_v25 = vmax.f32 %v103_v23, 0.0 }
  0xcc   :  { %307 = vmatmul.mubr.f32.vlgmr.msra.gmra.mxu1 %v106_v25 }
 0x18c   :  { %v196_v27 = vpop.f32.mrf.mxu1 }
 0x18d   :  { %v197_v28 = vadd.f32 %v243_v26, %v196_v27 }
 0x18e   :  { %v308_v29 = vpop.f32.mrf.mxu1 }
 0x18f   :  { %201 = vrot.lane.b32.xlu0 %v197_v28, %s344_s0 }
 0x201   :  { %v202_v31 = vpop.permute.xlu0 %201 }
 0x202   :  { %v204_v32 = vsub.f32 %v197_v28, %v202_v31 }
 0x204   :  { %v205_v33 = vmul.f32 1.442695, %v204_v32 }
 0x206   :  { %316 = vpow2.f32 %v205_v33 }
 0x213   :  { %v317_v34 = vpop.eup %316 }
 0x214   :  { %v207_v35 = vadd.f32 1.0, %v317_v34 }
 0x216   :  { %318 = vrcp.f32 %v207_v35 }
 0x223   :  { %v319_v36 = vpop.eup %318 }
 0x224   :  { %216 = vperm.xlu0 %314, %v319_v36   ;;  %v210_v37 = vsub.f32 1.0, %v319_v36 }
 0x226   :  { %221 = vperm.xlu1 %315, %v210_v37  }
 0x29f   :  { %v217_v40 = vpop.permute.xlu0 %216 }
 0x2a1   :  { %v222_v41 = vpop.permute.xlu1 %221 }
 0x2a2   :  { %v224_v42 = vsel %vm213_vm2, %v217_v40, %v222_v41 }
 0x2a3   :  { %226 = vst.msk [vmem:[#allocation2] sm:$0x3] %vm225_vm3, %v224_v42 }
 0x2a4   :  { %331 = shalt.err (!%p328_p4)
}
 0x2a5   :  { %236 = dma.vmem_to_hbm [thread:$0]  %s234_s3, 32, %s453_s5, [#allocation3]  }
 0x2a6   :  { %340 = dma.done.wait [#allocation3], 32  }
 0x2a7   :  { %341 = vsyncadd [#allocation3], 4294967264 }
 0x2a8   :  { %240 = vsyncpa [#allocation3], 1 }

</bundles_post_ra>
